<compile_context>
chip_gen: v5e
topology: v5e:2x2
jax: 0.10.0
libtpu: 0.0.40
codegen_flags: <defaults>
</compile_context>

<pallas_src>
import functools

import jax
import jax.numpy as jnp
from jax import lax
from jax.experimental import pallas as pl
from jax.experimental.pallas import tpu as pltpu


def _leaky_relu(x, alpha):
    return jnp.where(x > 0, x, alpha * x)


def _dnnperf_kernel(src_ref, dst_ref, h_ref, e_ref,
                    w_u_ref, w_e_ref, a_src_ref, a_dst_ref, w_m_ref,
                    w1_ref, b1_ref, w2_ref, b2_ref, w3_ref, b3_ref,
                    w4_ref, b4_ref, out_ref, *, alpha):
    f32 = jnp.float32
    n_nodes = h_ref.shape[0]
    n_edges = src_ref.shape[0]

    # --- ANEENodeUpdate: h_prime = leaky_relu(h @ W_u) ----------------------
    h_prime = jnp.dot(h_ref[...], w_u_ref[...], preferred_element_type=f32)
    h_prime = _leaky_relu(h_prime, alpha)                                 # (N, H)

    # One-hot (E, N) selection matrices: gathers become MXU matmuls.
    node_iota = lax.broadcasted_iota(jnp.int32, (n_edges, n_nodes), 1)
    onehot_src = (node_iota == src_ref[...]).astype(f32)                  # (E, N)
    onehot_dst = (node_iota == dst_ref[...]).astype(f32)                  # (E, N)

    # --- ANEEEdgeUpdate: sigmoid(cat([h_s, h_d]) @ a) * (e @ W_e) -----------
    # cat([h_s, h_d]) @ a == h_s @ a_src + h_d @ a_dst.  Compute per-node
    # scores first, then gather per-edge with the one-hot matmuls.
    s_src = jnp.dot(h_prime, a_src_ref[...], preferred_element_type=f32)  # (N, 1)
    s_dst = jnp.dot(h_prime, a_dst_ref[...], preferred_element_type=f32)  # (N, 1)
    score = (jnp.dot(onehot_src, s_src, preferred_element_type=f32)
             + jnp.dot(onehot_dst, s_dst, preferred_element_type=f32))    # (E, 1)
    gate = 1.0 / (1.0 + jnp.exp(-score))
    e_new = gate * jnp.dot(e_ref[...], w_e_ref[...],
                           preferred_element_type=f32)                    # (E, H)

    # --- ANEENodeFinalUpdate: softmax(e_new @ W_m, dim=0) * h_prime[src] ----
    m = jnp.dot(e_new, w_m_ref[...], preferred_element_type=f32)          # (E, 1)
    m = m - jnp.max(m, axis=0, keepdims=True)
    p = jnp.exp(m)
    sm = p / jnp.sum(p, axis=0, keepdims=True)                            # (E, 1)
    h_src = jnp.dot(onehot_src, h_prime, preferred_element_type=f32)      # (E, H)
    h_new_e = _leaky_relu(sm * h_src, alpha)                              # (E, H)

    # fn.sum('h_new') over dst followed by dgl.sum_nodes == sum over all edges.
    hg = jnp.sum(h_new_e, axis=0, keepdims=True)                          # (1, H)

    # --- ANEEGlobalAggregation MLP ------------------------------------------
    x = jnp.maximum(jnp.dot(hg, w1_ref[...], preferred_element_type=f32)
                    + b1_ref[...], 0.0)
    x = jnp.maximum(jnp.dot(x, w2_ref[...], preferred_element_type=f32)
                    + b2_ref[...], 0.0)
    x = jnp.maximum(jnp.dot(x, w3_ref[...], preferred_element_type=f32)
                    + b3_ref[...], 0.0)
    out = jnp.dot(x, w4_ref[...], preferred_element_type=f32) + b4_ref[...]
    out_ref[...] = out.astype(out_ref.dtype)


def dnnperf_forward(h, e, src, dst, params, *, alpha=0.01):
    """Fused DNNPerf forward. h: (N, Din), e: (E, De), src/dst: (E,) int32."""
    n_edges = src.shape[0]
    src2 = src.reshape(n_edges, 1).astype(jnp.int32)
    dst2 = dst.reshape(n_edges, 1).astype(jnp.int32)

    hid = params["w_u"].shape[1]
    a_src = params["a"][:hid]          # (H, 1)
    a_dst = params["a"][hid:]          # (H, 1)

    args = (src2, dst2, h, e,
            params["w_u"], params["w_e"], a_src, a_dst, params["w_m"],
            params["w1"], params["b1"], params["w2"], params["b2"],
            params["w3"], params["b3"], params["w4"], params["b4"])

    kernel = functools.partial(_dnnperf_kernel, alpha=alpha)
    return pl.pallas_call(
        kernel,
        out_shape=jax.ShapeDtypeStruct((1, 1), jnp.float32),
        # Everything (activations + params) fits in VMEM at these sizes, so run
        # a single un-gridded invocation with whole arrays resident in VMEM.
        in_specs=[pl.BlockSpec(memory_space=pltpu.MemorySpace.VMEM)] * len(args),
        out_specs=pl.BlockSpec(memory_space=pltpu.MemorySpace.VMEM),
    )(*args)


def _reference_forward(h, e, src, dst, params, *, alpha=0.01):
    """Pure-JAX reference matching the PyTorch/DGL semantics."""
    leaky = lambda x: jnp.where(x > 0, x, alpha * x)
    relu = lambda x: jnp.maximum(x, 0.0)

    h_prime = leaky(h @ params["w_u"])
    combined = jnp.concatenate([h_prime[src], h_prime[dst]], axis=-1)
    score = combined @ params["a"]
    e_new = jax.nn.sigmoid(score) * (e @ params["w_e"])

    m = e_new @ params["w_m"]
    sm = jax.nn.softmax(m, axis=0)                       # softmax over all edges
    h_new_e = leaky(sm * h_prime[src])
    h_new_nodes = jax.ops.segment_sum(h_new_e, dst, num_segments=h.shape[0])
    hg = jnp.sum(h_new_nodes, axis=0, keepdims=True)     # dgl.sum_nodes

    x = relu(hg @ params["w1"] + params["b1"])
    x = relu(x @ params["w2"] + params["b2"])
    x = relu(x @ params["w3"] + params["b3"])
    return x @ params["w4"] + params["b4"]


if __name__ == "__main__":
    N, E = 8, 16
    IN_NODE, NODE_HID = 32, 32
    IN_EDGE, EDGE_HID = 32, 32   # node_hidden == edge_hidden (required by `a` in the spec)
    ALPHA = 0.01

    key = jax.random.PRNGKey(0)
    keys = jax.random.split(key, 16)

    h = jax.random.normal(keys[0], (N, IN_NODE), jnp.float32)
    e = jax.random.normal(keys[1], (E, IN_EDGE), jnp.float32)
    src = jax.random.randint(keys[2], (E,), 0, N, dtype=jnp.int32)
    dst = jax.random.randint(keys[3], (E,), 0, N, dtype=jnp.int32)

    def lin(k, fan_in, fan_out):
        return jax.random.normal(k, (fan_in, fan_out), jnp.float32) / (float(fan_in) ** 0.5)

    params = dict(
        w_u=lin(keys[4], IN_NODE, NODE_HID),
        w_e=lin(keys[5], IN_EDGE, EDGE_HID),
        a=lin(keys[6], 2 * EDGE_HID, 1),
        w_m=lin(keys[7], EDGE_HID, 1),
        w1=lin(keys[8], NODE_HID, 512),
        b1=0.01 * jax.random.normal(keys[9], (1, 512), jnp.float32),
        w2=lin(keys[10], 512, 128),
        b2=0.01 * jax.random.normal(keys[11], (1, 128), jnp.float32),
        w3=lin(keys[12], 128, 16),
        b3=0.01 * jax.random.normal(keys[13], (1, 16), jnp.float32),
        w4=lin(keys[14], 16, 1),
        b4=0.01 * jax.random.normal(keys[15], (1, 1), jnp.float32),
    )

    out = dnnperf_forward(h, e, src, dst, params, alpha=ALPHA)
    out = jax.block_until_ready(out)

    ref = _reference_forward(h, e, src, dst, params, alpha=ALPHA)
    assert out.shape == (1, 1), out.shape
    assert jnp.allclose(out, ref, atol=2e-3, rtol=2e-3), (out, ref)

    print("KERNEL_OK")
</pallas_src>

<mosaic_0001>
module attributes {stable_mosaic.version = 11 : i64} {
  func.func @_dnnperf_kernel(%arg0: memref<16x1xi32, #tpu.memory_space<vmem>>, %arg1: memref<16x1xi32, #tpu.memory_space<vmem>>, %arg2: memref<8x32xf32, #tpu.memory_space<vmem>>, %arg3: memref<16x32xf32, #tpu.memory_space<vmem>>, %arg4: memref<32x32xf32, #tpu.memory_space<vmem>>, %arg5: memref<32x32xf32, #tpu.memory_space<vmem>>, %arg6: memref<32x1xf32, #tpu.memory_space<vmem>>, %arg7: memref<32x1xf32, #tpu.memory_space<vmem>>, %arg8: memref<32x1xf32, #tpu.memory_space<vmem>>, %arg9: memref<32x512xf32, #tpu.memory_space<vmem>>, %arg10: memref<1x512xf32, #tpu.memory_space<vmem>>, %arg11: memref<512x128xf32, #tpu.memory_space<vmem>>, %arg12: memref<1x128xf32, #tpu.memory_space<vmem>>, %arg13: memref<128x16xf32, #tpu.memory_space<vmem>>, %arg14: memref<1x16xf32, #tpu.memory_space<vmem>>, %arg15: memref<16x1xf32, #tpu.memory_space<vmem>>, %arg16: memref<1x1xf32, #tpu.memory_space<vmem>>, %arg17: memref<1x1xf32, #tpu.memory_space<vmem>>) attributes {dimension_semantics = [], scalar_prefetch = 0 : i64, scratch_operands = 0 : i64, tpu.core_type = #tpu.core_type<tc>} {
    %c0 = arith.constant 0 : index
    %c0_0 = arith.constant 0 : index
    %0 = vector.load %arg2[%c0, %c0_0] : memref<8x32xf32, #tpu.memory_space<vmem>>, vector<8x32xf32>
    %c0_1 = arith.constant 0 : index
    %c0_2 = arith.constant 0 : index
    %1 = vector.load %arg4[%c0_1, %c0_2] : memref<32x32xf32, #tpu.memory_space<vmem>>, vector<32x32xf32>
    %cst = arith.constant dense<0.000000e+00> : vector<8x32xf32>
    %2 = tpu.matmul %0, %1, %cst {dimension_numbers = #tpu.dot_dimension_numbers<[1], [0], [0], [1], [0, 0, 1, 1], [], []>} : vector<8x32xf32>, vector<32x32xf32>, vector<8x32xf32> -> vector<8x32xf32>
    %cst_3 = arith.constant 0.000000e+00 : f32
    %3 = vector.broadcast %cst_3 : f32 to vector<8x32xf32>
    %4 = arith.cmpf ogt, %2, %3 : vector<8x32xf32>
    %cst_4 = arith.constant 0.00999999977 : f32
    %5 = vector.broadcast %cst_4 : f32 to vector<8x32xf32>
    %6 = arith.mulf %5, %2 : vector<8x32xf32>
    %7 = arith.select %4, %2, %6 : vector<8x32xi1>, vector<8x32xf32>
    %8 = tpu.iota {dimensions = array<i32: 1>} : vector<16x8xi32>
    %c0_5 = arith.constant 0 : index
    %c0_6 = arith.constant 0 : index
    %9 = vector.load %arg0[%c0_5, %c0_6] : memref<16x1xi32, #tpu.memory_space<vmem>>, vector<16x1xi32>
    %10 = vector.broadcast %9 : vector<16x1xi32> to vector<16x8xi32>
    %11 = arith.cmpi eq, %8, %10 : vector<16x8xi32>
    %12 = arith.extui %11 : vector<16x8xi1> to vector<16x8xi32>
    %13 = arith.sitofp %12 : vector<16x8xi32> to vector<16x8xf32>
    %c0_7 = arith.constant 0 : index
    %c0_8 = arith.constant 0 : index
    %14 = vector.load %arg1[%c0_7, %c0_8] : memref<16x1xi32, #tpu.memory_space<vmem>>, vector<16x1xi32>
    %15 = vector.broadcast %14 : vector<16x1xi32> to vector<16x8xi32>
    %16 = arith.cmpi eq, %8, %15 : vector<16x8xi32>
    %17 = arith.extui %16 : vector<16x8xi1> to vector<16x8xi32>
    %18 = arith.sitofp %17 : vector<16x8xi32> to vector<16x8xf32>
    %c0_9 = arith.constant 0 : index
    %c0_10 = arith.constant 0 : index
    %19 = vector.load %arg6[%c0_9, %c0_10] : memref<32x1xf32, #tpu.memory_space<vmem>>, vector<32x1xf32>
    %cst_11 = arith.constant dense<0.000000e+00> : vector<8x1xf32>
    %20 = tpu.matmul %7, %19, %cst_11 {dimension_numbers = #tpu.dot_dimension_numbers<[1], [0], [0], [1], [0, 0, 1, 1], [], []>} : vector<8x32xf32>, vector<32x1xf32>, vector<8x1xf32> -> vector<8x1xf32>
    %c0_12 = arith.constant 0 : index
    %c0_13 = arith.constant 0 : index
    %21 = vector.load %arg7[%c0_12, %c0_13] : memref<32x1xf32, #tpu.memory_space<vmem>>, vector<32x1xf32>
    %cst_14 = arith.constant dense<0.000000e+00> : vector<8x1xf32>
    %22 = tpu.matmul %7, %21, %cst_14 {dimension_numbers = #tpu.dot_dimension_numbers<[1], [0], [0], [1], [0, 0, 1, 1], [], []>} : vector<8x32xf32>, vector<32x1xf32>, vector<8x1xf32> -> vector<8x1xf32>
    %cst_15 = arith.constant dense<0.000000e+00> : vector<16x1xf32>
    %23 = tpu.matmul %13, %20, %cst_15 {dimension_numbers = #tpu.dot_dimension_numbers<[1], [0], [0], [1], [0, 0, 1, 1], [], []>} : vector<16x8xf32>, vector<8x1xf32>, vector<16x1xf32> -> vector<16x1xf32>
    %cst_16 = arith.constant dense<0.000000e+00> : vector<16x1xf32>
    %24 = tpu.matmul %18, %22, %cst_16 {dimension_numbers = #tpu.dot_dimension_numbers<[1], [0], [0], [1], [0, 0, 1, 1], [], []>} : vector<16x8xf32>, vector<8x1xf32>, vector<16x1xf32> -> vector<16x1xf32>
    %25 = arith.addf %23, %24 : vector<16x1xf32>
    %cst_17 = arith.constant 0.000000e+00 : f32
    %26 = vector.broadcast %cst_17 : f32 to vector<16x1xf32>
    %27 = arith.subf %26, %25 : vector<16x1xf32>
    %28 = math.exp %27 : vector<16x1xf32>
    %cst_18 = arith.constant 1.000000e+00 : f32
    %29 = vector.broadcast %cst_18 : f32 to vector<16x1xf32>
    %30 = arith.addf %29, %28 : vector<16x1xf32>
    %cst_19 = arith.constant 1.000000e+00 : f32
    %31 = vector.broadcast %cst_19 : f32 to vector<16x1xf32>
    %32 = arith.divf %31, %30 : vector<16x1xf32>
    %c0_20 = arith.constant 0 : index
    %c0_21 = arith.constant 0 : index
    %33 = vector.load %arg3[%c0_20, %c0_21] : memref<16x32xf32, #tpu.memory_space<vmem>>, vector<16x32xf32>
    %c0_22 = arith.constant 0 : index
    %c0_23 = arith.constant 0 : index
    %34 = vector.load %arg5[%c0_22, %c0_23] : memref<32x32xf32, #tpu.memory_space<vmem>>, vector<32x32xf32>
    %cst_24 = arith.constant dense<0.000000e+00> : vector<16x32xf32>
    %35 = tpu.matmul %33, %34, %cst_24 {dimension_numbers = #tpu.dot_dimension_numbers<[1], [0], [0], [1], [0, 0, 1, 1], [], []>} : vector<16x32xf32>, vector<32x32xf32>, vector<16x32xf32> -> vector<16x32xf32>
    %36 = vector.broadcast %32 : vector<16x1xf32> to vector<16x32xf32>
    %37 = arith.mulf %36, %35 : vector<16x32xf32>
    %c0_25 = arith.constant 0 : index
    %c0_26 = arith.constant 0 : index
    %38 = vector.load %arg8[%c0_25, %c0_26] : memref<32x1xf32, #tpu.memory_space<vmem>>, vector<32x1xf32>
    %cst_27 = arith.constant dense<0.000000e+00> : vector<16x1xf32>
    %39 = tpu.matmul %37, %38, %cst_27 {dimension_numbers = #tpu.dot_dimension_numbers<[1], [0], [0], [1], [0, 0, 1, 1], [], []>} : vector<16x32xf32>, vector<32x1xf32>, vector<16x1xf32> -> vector<16x1xf32>
    %cst_28 = arith.constant dense<0xFF800000> : vector<1xf32>
    %40 = vector.multi_reduction <maximumf>, %39, %cst_28 [0] : vector<16x1xf32> to vector<1xf32>
    %41 = vector.shape_cast %40 : vector<1xf32> to vector<1x1xf32>
    %42 = vector.broadcast %41 : vector<1x1xf32> to vector<16x1xf32>
    %43 = arith.subf %39, %42 : vector<16x1xf32>
    %44 = math.exp %43 : vector<16x1xf32>
    %cst_29 = arith.constant dense<0.000000e+00> : vector<1xf32>
    %45 = vector.multi_reduction <add>, %44, %cst_29 [0] : vector<16x1xf32> to vector<1xf32>
    %46 = vector.shape_cast %45 : vector<1xf32> to vector<1x1xf32>
    %47 = vector.broadcast %46 : vector<1x1xf32> to vector<16x1xf32>
    %48 = arith.divf %44, %47 : vector<16x1xf32>
    %cst_30 = arith.constant dense<0.000000e+00> : vector<16x32xf32>
    %49 = tpu.matmul %13, %7, %cst_30 {dimension_numbers = #tpu.dot_dimension_numbers<[1], [0], [0], [1], [0, 0, 1, 1], [], []>} : vector<16x8xf32>, vector<8x32xf32>, vector<16x32xf32> -> vector<16x32xf32>
    %50 = vector.broadcast %48 : vector<16x1xf32> to vector<16x32xf32>
    %51 = arith.mulf %50, %49 : vector<16x32xf32>
    %cst_31 = arith.constant 0.000000e+00 : f32
    %52 = vector.broadcast %cst_31 : f32 to vector<16x32xf32>
    %53 = arith.cmpf ogt, %51, %52 : vector<16x32xf32>
    %cst_32 = arith.constant 0.00999999977 : f32
    %54 = vector.broadcast %cst_32 : f32 to vector<16x32xf32>
    %55 = arith.mulf %54, %51 : vector<16x32xf32>
    %56 = arith.select %53, %51, %55 : vector<16x32xi1>, vector<16x32xf32>
    %cst_33 = arith.constant dense<0.000000e+00> : vector<32xf32>
    %57 = vector.multi_reduction <add>, %56, %cst_33 [0] : vector<16x32xf32> to vector<32xf32>
    %58 = vector.shape_cast %57 : vector<32xf32> to vector<1x32xf32>
    %c0_34 = arith.constant 0 : index
    %c0_35 = arith.constant 0 : index
    %59 = vector.load %arg9[%c0_34, %c0_35] : memref<32x512xf32, #tpu.memory_space<vmem>>, vector<32x512xf32>
    %cst_36 = arith.constant dense<0.000000e+00> : vector<1x512xf32>
    %60 = tpu.matmul %58, %59, %cst_36 {dimension_numbers = #tpu.dot_dimension_numbers<[1], [0], [0], [1], [0, 0, 1, 1], [], []>} : vector<1x32xf32>, vector<32x512xf32>, vector<1x512xf32> -> vector<1x512xf32>
    %c0_37 = arith.constant 0 : index
    %c0_38 = arith.constant 0 : index
    %61 = vector.load %arg10[%c0_37, %c0_38] : memref<1x512xf32, #tpu.memory_space<vmem>>, vector<1x512xf32>
    %62 = arith.addf %60, %61 : vector<1x512xf32>
    %cst_39 = arith.constant 0.000000e+00 : f32
    %63 = vector.broadcast %cst_39 : f32 to vector<1x512xf32>
    %64 = arith.maximumf %62, %63 : vector<1x512xf32>
    %c0_40 = arith.constant 0 : index
    %c0_41 = arith.constant 0 : index
    %65 = vector.load %arg11[%c0_40, %c0_41] : memref<512x128xf32, #tpu.memory_space<vmem>>, vector<512x128xf32>
    %cst_42 = arith.constant dense<0.000000e+00> : vector<1x128xf32>
    %66 = tpu.matmul %64, %65, %cst_42 {dimension_numbers = #tpu.dot_dimension_numbers<[1], [0], [0], [1], [0, 0, 1, 1], [], []>} : vector<1x512xf32>, vector<512x128xf32>, vector<1x128xf32> -> vector<1x128xf32>
    %c0_43 = arith.constant 0 : index
    %c0_44 = arith.constant 0 : index
    %67 = vector.load %arg12[%c0_43, %c0_44] : memref<1x128xf32, #tpu.memory_space<vmem>>, vector<1x128xf32>
    %68 = arith.addf %66, %67 : vector<1x128xf32>
    %cst_45 = arith.constant 0.000000e+00 : f32
    %69 = vector.broadcast %cst_45 : f32 to vector<1x128xf32>
    %70 = arith.maximumf %68, %69 : vector<1x128xf32>
    %c0_46 = arith.constant 0 : index
    %c0_47 = arith.constant 0 : index
    %71 = vector.load %arg13[%c0_46, %c0_47] : memref<128x16xf32, #tpu.memory_space<vmem>>, vector<128x16xf32>
    %cst_48 = arith.constant dense<0.000000e+00> : vector<1x16xf32>
    %72 = tpu.matmul %70, %71, %cst_48 {dimension_numbers = #tpu.dot_dimension_numbers<[1], [0], [0], [1], [0, 0, 1, 1], [], []>} : vector<1x128xf32>, vector<128x16xf32>, vector<1x16xf32> -> vector<1x16xf32>
    %c0_49 = arith.constant 0 : index
    %c0_50 = arith.constant 0 : index
    %73 = vector.load %arg14[%c0_49, %c0_50] : memref<1x16xf32, #tpu.memory_space<vmem>>, vector<1x16xf32>
    %74 = arith.addf %72, %73 : vector<1x16xf32>
    %cst_51 = arith.constant 0.000000e+00 : f32
    %75 = vector.broadcast %cst_51 : f32 to vector<1x16xf32>
    %76 = arith.maximumf %74, %75 : vector<1x16xf32>
    %c0_52 = arith.constant 0 : index
    %c0_53 = arith.constant 0 : index
    %77 = vector.load %arg15[%c0_52, %c0_53] : memref<16x1xf32, #tpu.memory_space<vmem>>, vector<16x1xf32>
    %cst_54 = arith.constant dense<0.000000e+00> : vector<1x1xf32>
    %78 = tpu.matmul %76, %77, %cst_54 {dimension_numbers = #tpu.dot_dimension_numbers<[1], [0], [0], [1], [0, 0, 1, 1], [], []>} : vector<1x16xf32>, vector<16x1xf32>, vector<1x1xf32> -> vector<1x1xf32>
    %c0_55 = arith.constant 0 : index
    %c0_56 = arith.constant 0 : index
    %79 = vector.load %arg16[%c0_55, %c0_56] : memref<1x1xf32, #tpu.memory_space<vmem>>, vector<1x1xf32>
    %80 = arith.addf %78, %79 : vector<1x1xf32>
    %c0_57 = arith.constant 0 : index
    %c0_58 = arith.constant 0 : index
    %81 = vector.load %arg17[%c0_57, %c0_58] : memref<1x1xf32, #tpu.memory_space<vmem>>, vector<1x1xf32>
    tpu.vector_store %arg17[%c0_57, %c0_58], %80 {strides = array<i32>} : memref<1x1xf32, #tpu.memory_space<vmem>>, vector<1x1xf32>,
    return
  }
}

</mosaic_0001>

<bundles_post_ra>
// kernel: tpu_custom_call.1
= control target key start
LH: loop header
LB: loop body
LE: loop exit
PB: predicated region body
PF: predicated region fallthrough
CT: control target
= control target key end

     0   :  { %s1216_s0 = inlined_call_operand.vmem [shape: s32[16,1], index: 0, kind: input, shape index: {}]   ;;  %s1217_s1 = inlined_call_operand.vmem [shape: s32[16,1], index: 1, kind: input, shape index: {}]   ;;  %s1218_s2 = inlined_call_operand.vmem [shape: f32[8,32], index: 2, kind: input, shape index: {}]   ;;  %s1219_s3 = inlined_call_operand.vmem [shape: f32[16,32], index: 3, kind: input, shape index: {}]   ;;  %s1220_s4 = inlined_call_operand.vmem [shape: f32[32,32], index: 4, kind: input, shape index: {}]   ;;  %s1221_s5 = inlined_call_operand.vmem [shape: f32[32,32], index: 5, kind: input, shape index: {}]   ;;  %s1222_s6 = inlined_call_operand.vmem [shape: f32[32,1], index: 6, kind: input, shape index: {}]   ;;  %s1223_s7 = inlined_call_operand.vmem [shape: f32[32,1], index: 7, kind: input, shape index: {}]   ;;  %s1224_s8 = inlined_call_operand.vmem [shape: f32[32,1], index: 8, kind: input, shape index: {}]   ;;  %s1225_s9 = inlined_call_operand.vmem [shape: f32[32,512], index: 9, kind: input, shape index: {}]   ;;  %s1226_s10 = inlined_call_operand.vmem [shape: f32[1,512], index: 10, kind: input, shape index: {}]   ;;  %s1227_s11 = inlined_call_operand.hbm [shape: f32[512,128], index: 11, kind: input, shape index: {}]   ;;  %s1228_s12 = inlined_call_operand.vmem [shape: f32[1,128], index: 12, kind: input, shape index: {}]   ;;  %s1229_s13 = inlined_call_operand.vmem [shape: f32[128,16], index: 13, kind: input, shape index: {}]   ;;  %s1230_s14 = inlined_call_operand.vmem [shape: f32[1,16], index: 14, kind: input, shape index: {}]   ;;  %s1231_s15 = inlined_call_operand.vmem [shape: f32[16,1], index: 15, kind: input, shape index: {}]   ;;  %s1232_s16 = inlined_call_operand.<no memory space> [shape: f32[1,1], index: 16, kind: input, shape index: {}]   ;;  %s1233_s17 = inlined_call_operand.hbm [shape: f32[1,1], index: 17, kind: output, shape index: {}]  }
   0x1   :  { %1236 = sst [smem:[#allocation9_spill]] %s1216_s0  ;;  %v22_v0 = vstv %s1232_s16 }
   0x2   :  { %1237 = sst [smem:[#allocation10_spill]] %s1217_s1  ;;  %23 = vst [vmem:[#allocation2] sm:$0x1] %v22_v0 }
   0x3   :  { %24 = vsyncpa [#allocation4], 0 }
   0x4   :  { %25 = vsyncpa [#allocation5], 0  ;;  %s52_s28 = sshll.u32 %s1227_s11, 4  ;;  %s896_s29 = smov [#allocation3]   ;;  %s53_s28 = int_to_ptr.hbm [resolvable:$true] %s52_s28 }
   0x5   :  { %s54_s0 = sshll.u32 %s896_s29, 4  ;;  %s897_s30 = smov 128   ;;  %s55_s0 = int_to_ptr.vmem [resolvable:$true] %s54_s0 }
   0x6   :  { %s898_s18 = smov 8  }
   0x7   :  { %60 = dma.hbm_to_vmem [thread:$0]  %s53_s28, 8192, %s55_s0, [#allocation4], %s897_s30, %s897_s30, %s898_s18  }
   0x8   :  { %892 = dma.done.wait [#allocation4], 8192  }
   0x9   :  { %893 = vsyncadd [#allocation4], 4294959104  ;;  %v79_v1 = vld [vmem:[%s1220_s4 + $0x18] sm:$0xff]  ;;  %v78_v2 = vld [vmem:[%s1220_s4 + $0x10] sm:$0xff]  ;;  %vm80_vm0 = vcmask 261120   ;;  %v899_v14 = vmov 0   ;;  %v107_v22 = vlaneseq }
   0xa   :  { %96 = vmatpush.msra.mxu0 %v79_v1  ;;  %v77_v3 = vld [vmem:[%s1220_s4 + $0x8] sm:$0xff]  ;;  %v140_v4 = vld [vmem:[%s1222_s6 + $0x18] sm:$0xff]  ;;  %v139_v6 = vld [vmem:[%s1222_s6 + $0x10] sm:$0xff]  ;;  %827 = vset.pattern.permute.xlu0 %v899_v14  ;;  %s1238_s25 = sld [smem:[#allocation9_spill]]  ;;  %vm188_vm3 = vcmask 64512   ;;  %v900_v29 = vmov 0.0  }
   0xb   :  { %156 = vmatpush.msra.mxu1 %v140_v4  ;;  %v167_v5 = vld [vmem:[%s1223_s7 + $0x18] sm:$0xff]  ;;  %v166_v7 = vld [vmem:[%s1223_s7 + $0x10] sm:$0xff]  ;;  %v76_v8 = vld [vmem:[%s1220_s4] sm:$0xff]  ;;  %828 = vset.pattern.permute.xlu1 %v899_v14  ;;  %s1239_s29 = sld [smem:[#allocation10_spill]]  ;;  %v108_v24 = vand.u32 127, %v107_v22  ;;  %vm365_vm15 = vcmask 7168  }
   0xc   :  { %97 = vmatpush.msra.mxu0 %v78_v2  ;;  %180 = vmatpush.msra.mxu2 %v167_v5  ;;  %v75_v9 = vld [vmem:[%s1218_s2] sm:$0xff]  ;;  %v138_v10 = vld [vmem:[%s1222_s6 + $0x8] sm:$0xff]  ;;  %v290_v27 = vld [vmem:[%s1221_s5 + $0x18] sm:$0xff] }
   0xd   :  { %157 = vmatpush.msra.mxu1 %v139_v6  ;;  %v165_v11 = vld [vmem:[%s1223_s7 + $0x8] sm:$0xff]  ;;  %v137_v12 = vld [vmem:[%s1222_s6] sm:$0xff]  ;;  %829 = vset.pattern.permute.xlu2 %v899_v14  ;;  %v289_v28 = vld [vmem:[%s1221_s5 + $0x10] sm:$0xff] }
   0xe   :  { %98 = vmatpush.msra.mxu0 %v77_v3  ;;  %181 = vmatpush.msra.mxu2 %v166_v7  ;;  %v164_v13 = vld [vmem:[%s1223_s7] sm:$0xff]  ;;  %v288_v37 = vld [vmem:[%s1221_s5 + $0x8] sm:$0xff]  ;;  %v335_v49 = vld [vmem:[%s1224_s8 + $0x18] sm:$0xff] }
   0xf   :  { %158 = vmatpush.msra.mxu1 %v138_v10  ;;  %v287_v38 = vld [vmem:[%s1221_s5] sm:$0xff]  ;;  %v286_v40 = vld [vmem:[%s1219_s3 + $0x8] sm:$0xff]  ;;  %v334_v50 = vld [vmem:[%s1224_s8 + $0x10] sm:$0xff] }
  0x10   :  { %99 = vmatpush.msra.mxu0 %v76_v8  ;;  %182 = vmatpush.msra.mxu2 %v165_v11  ;;  %v109_v15 = vld [vmem:[%s1238_s25] sm:$0xff]  ;;  %v110_v16 = vld [vmem:[%s1238_s25 + $0x8] sm:$0xff] }
  0x11   :  { %799 = vmatmul.msk.f32.vlgmr.msra.gmra.mxu0 %vm80_vm0, %v75_v9  ;;  %159 = vmatpush.msra.mxu1 %v137_v12  ;;  %v123_v17 = vld [vmem:[%s1239_s29] sm:$0xff]  ;;  %v124_v18 = vld [vmem:[%s1239_s29 + $0x8] sm:$0xff] }
  0x12   :  { %183 = vmatpush.msra.mxu2 %v164_v13  ;;  %112 = vperm.xlu0 %827, %v109_v15   ;;  %v285_v39 = vld [vmem:[%s1219_s3] sm:$0xff]  ;;  %v333_v52 = vld [vmem:[%s1224_s8 + $0x8] sm:$0xff] }
  0x13   :  { %115 = vperm.xlu1 %828, %v110_v16   ;;  %309 = vmatpush.msrb.mxu1 %v290_v27  ;;  %v332_v14 = vld [vmem:[%s1224_s8] sm:$0xff]  ;;  %s789_s8 = sshll.u32 %s1233_s17, 4  ;;  %s790_s8 = int_to_ptr.hbm [resolvable:$true] %s789_s8 }
  0x15   :  { %310 = vmatpush.msrb.mxu1 %v289_v28 }
  0x17   :  { %311 = vmatpush.msrb.mxu1 %v288_v37 }
  0x19   :  { %312 = vmatpush.msrb.mxu1 %v287_v38 }
  0x1a   :  { %126 = vperm.xlu0 %827, %v123_v17  }
  0x1b   :  { %129 = vperm.xlu1 %828, %v124_v18  }
  0x84   :  { %v113_v23 = vpop.permute.xlu0 %112 }
  0x85   :  { %vm117_vm2 = vcmp.eq.s32.totalorder %v108_v24, %v113_v23  ;;  %v116_v25 = vpop.permute.xlu1 %115 }
  0x86   :  { %v800_v30 = vsel %vm117_vm2, 1.0, %v900_v29  ;;  %vm118_vm5 = vcmp.eq.s32.totalorder %v108_v24, %v116_v25 }
  0x87   :  { %v801_v34 = vsel %vm118_vm5, 1.0, %v900_v29 }
  0x8c   :  { %v127_v31 = vpop.permute.xlu0 %126 }
  0x8d   :  { %vm131_vm4 = vcmp.eq.s32.totalorder %v108_v24, %v127_v31  ;;  %v130_v35 = vpop.permute.xlu1 %129 }
  0x8e   :  { %v101_v19 = vpop.f32.mrf.mxu0  ;;  %v802_v33 = vsel %vm131_vm4, 1.0, %v900_v29  ;;  %vm132_vm6 = vcmp.eq.s32.totalorder %v108_v24, %v130_v35 }
  0x8f   :  { %vm104_vm1 = vcmp.gt.f32.partialorder %v101_v19, 0.0  ;;  %v105_v20 = vmul.f32 0.01, %v101_v19  ;;  %v803_v36 = vsel %vm132_vm6, 1.0, %v900_v29 }
  0x91   :  { %v106_v21 = vsel %vm104_vm1, %v101_v19, %v105_v20 }
  0x92   :  { %804 = vmatmul.msk.f32.vlgmr.msra.gmra.mxu1 %vm80_vm0, %v106_v21  ;;  %805 = vmatmul.msk.f32.vlgmr.msra.gmra.mxu2 %vm80_vm0, %v106_v21 }
  0x9a   :  { %810 = vmatmul.msk.f32.vlgmr.msrb.gmra.mxu1 %vm80_vm0, %v285_v39 }
  0xa2   :  { %811 = vmatmul.msk.f32.gmra.mxu1 %vm80_vm0, %v286_v40 }
 0x10f   :  { %v161_v26 = vpop.f32.mrf.mxu1 }
 0x110   :  { %239 = vmatpush.msrb.mxu2 %v161_v26 }
 0x111   :  { %808 = vmatmul.msk.f32.vlgmr.msrb.gmra.mxu2 %vm188_vm3, %v800_v30 }
 0x112   :  { %354 = vmatpush.msra.mxu2 %v335_v49 }
 0x114   :  { %355 = vmatpush.msra.mxu2 %v334_v50 }
 0x115   :  { %v185_v32 = vpop.f32.mrf.mxu2 }
 0x116   :  { %210 = vmatpush.msra.mxu3 %v185_v32  ;;  %356 = vmatpush.msra.mxu2 %v333_v52 }
 0x117   :  { %806 = vmatmul.msk.f32.vlgmr.msra.gmra.mxu3 %vm188_vm3, %v802_v33  ;;  %v314_v15 = vpop.f32.mrf.mxu1 }
 0x118   :  { %421 = vmatpush.msrb.mxu3 %v106_v21  ;;  %357 = vmatpush.msra.mxu2 %v332_v14  ;;  %v584_v14 = vld [vmem:[#allocation3 + $0x78] sm:$0xff] }
 0x119   :  { %809 = vmatmul.msk.f32.gmra.mxu2 %vm188_vm3, %v801_v34  ;;  %634 = vmatpush.msrb.mxu0 %v584_v14  ;;  %v585_v14 = vld [vmem:[#allocation3 + $0x80] sm:$0xff] }
 0x11f   :  { %807 = vmatmul.msk.f32.gmra.mxu3 %vm188_vm3, %v803_v36  ;;  %v317_v18 = vpop.f32.mrf.mxu1 }
 0x127   :  { %814 = vmatmul.msk.f32.vlgmr.msrb.gmra.mxu3 %vm188_vm3, %v800_v30 }
 0x12f   :  { %815 = vmatmul.msk.f32.gmra.mxu3 %vm188_vm3, %v801_v34 }
 0x194   :  { %v241_v41 = vpop.f32.mrf.mxu2 }
 0x19a   :  { %v212_v42 = vpop.f32.mrf.mxu3 }
 0x19b   :  { %v242_v43 = vadd.f32 %v241_v41, %v212_v42 }
 0x19c   :  { %v244_v46 = vpop.f32.mrf.mxu2 }
 0x19d   :  { %v247_v44 = vsub.f32 0.0, %v242_v43 }
 0x19f   :  { %v249_v45 = vmul.f32 1.442695, %v247_v44 }
 0x1a1   :  { %830 = vpow2.f32 %v249_v45 }
 0x1a2   :  { %v215_v47 = vpop.f32.mrf.mxu3 }
 0x1a3   :  { %v245_v48 = vadd.f32 %v244_v46, %v215_v47 }
 0x1a5   :  { %v248_v51 = vsub.f32 0.0, %v245_v48 }
 0x1a7   :  { %v831_v53 = vpop.eup %830  ;;  %v251_v54 = vmul.f32 1.442695, %v248_v51 }
 0x1a8   :  { %v253_v55 = vadd.f32 1.0, %v831_v53 }
 0x1a9   :  { %832 = vpow2.f32 %v251_v54 }
 0x1aa   :  { %834 = vrcp.f32 %v253_v55  ;;  %v266_v61 = vand.u32 2147483648, %v253_v55  ;;  %v264_v63 = vand.u32 2147483647, %v253_v55  ;;  %vm260_vm8 = vweird.f32 %v253_v55 }
 0x1ac   :  { %v267_v2 = vor.u32 1.1754944e-38, %v266_v61  ;;  %vm265_vm10 = vcmp.eq.f32.partialorder %v264_v63, 8.507059e+37  ;;  %v469_v61 = vld [vmem:[%s1225_s9 + $0x68] sm:$0xff] }
 0x1ad   :  { %517 = vmatpush.msra.mxu1 %v469_v61  ;;  %v465_v63 = vld [vmem:[%s1225_s9 + $0x48] sm:$0xff] }
 0x1af   :  { %v833_v56 = vpop.eup %832  ;;  %518 = vmatpush.msra.mxu1 %v465_v63  ;;  %v588_v63 = vld [vmem:[#allocation3 + $0x98] sm:$0xff] }
 0x1b0   :  { %v835_v57 = vpop.eup %834  ;;  %v254_v58 = vadd.f32 1.0, %v833_v56 }
 0x1b1   :  { %v256_v59 = vmul.f32 %v835_v57, %v253_v55  ;;  %vm261_vm7 = vweird.f32 %v835_v57 }
 0x1b2   :  { %836 = vrcp.f32 %v254_v58  ;;  %vm262_vm9 = vmor %vm260_vm8, %vm261_vm7  ;;  %v281_v7 = vand.u32 2147483648, %v254_v58  ;;  %v279_v9 = vand.u32 2147483647, %v254_v58  ;;  %vm275_vm12 = vweird.f32 %v254_v58 }
 0x1b3   :  { %v257_v60 = vsub.f32 1.0, %v256_v59  ;;  %v468_v59 = vld [vmem:[%s1225_s9 + $0x60] sm:$0xff]  ;;  %vm780_vm7 = vcmask 0  }
 0x1b4   :  { %v282_v11 = vor.u32 1.1754944e-38, %v281_v7  ;;  %vm280_vm14 = vcmp.eq.f32.partialorder %v279_v9, 8.507059e+37  ;;  %497 = vmatpush.msra.mxu3 %v468_v59  ;;  %v423_v7 = vpop.f32.mrf.mxu3  ;;  %v467_v9 = vld [vmem:[%s1225_s9 + $0x58] sm:$0xff] }
 0x1b5   :  { %v258_v62 = vmul.f32 %v835_v57, %v257_v60  ;;  %v470_v60 = vld [vmem:[%s1225_s9 + $0x70] sm:$0xff] }
 0x1b6   :  { %537 = vmatpush.msrb.mxu2 %v470_v60  ;;  %v589_v60 = vld [vmem:[#allocation3 + $0xa0] sm:$0xff] }
 0x1b7   :  { %v259_v0 = vadd.f32 %v835_v57, %v258_v62  ;;  %v464_v62 = vld [vmem:[%s1225_s9 + $0x40] sm:$0xff] }
 0x1b8   :  { %v837_v1 = vpop.eup %836  ;;  %498 = vmatpush.msra.mxu3 %v464_v62  ;;  %v632_v62 = vld [vmem:[#allocation3 + $0x1f8] sm:$0xff] }
 0x1b9   :  { %v263_v3 = vsel %vm262_vm9, %v835_v57, %v259_v0  ;;  %v271_v4 = vmul.f32 %v837_v1, %v254_v58  ;;  %vm276_vm11 = vweird.f32 %v837_v1  ;;  %v466_v0 = vld [vmem:[%s1225_s9 + $0x50] sm:$0xff] }
 0x1ba   :  { %v268_v5 = vsel %vm265_vm10, %v267_v2, %v263_v3  ;;  %vm277_vm13 = vmor %vm275_vm12, %vm276_vm11  ;;  %538 = vmatpush.msrb.mxu2 %v466_v0  ;;  %v456_v2 = vld [vmem:[%s1225_s9] sm:$0xff]  ;;  %v461_v3 = vld [vmem:[%s1225_s9 + $0x28] sm:$0xff] }
 0x1bb   :  { %322 = vperm.xlu2 %829, %v268_v5   ;;  %v272_v6 = vsub.f32 1.0, %v271_v4  ;;  %v462_v4 = vld [vmem:[%s1225_s9 + $0x30] sm:$0xff]  ;;  %v457_v5 = vld [vmem:[%s1225_s9 + $0x8] sm:$0xff]  ;;  %519 = vmatpush.msra.mxu1 %v461_v3  ;;  %v628_v3 = vld [vmem:[#allocation3 + $0x1d8] sm:$0xff] }
 0x1bc   :  { %539 = vmatpush.msrb.mxu2 %v462_v4  ;;  %v631_v0 = vld [vmem:[#allocation3 + $0x1f0] sm:$0xff] }
 0x1bd   :  { %v273_v8 = vmul.f32 %v837_v1, %v272_v6  ;;  %v458_v6 = vld [vmem:[%s1225_s9 + $0x10] sm:$0xff]  ;;  %520 = vmatpush.msra.mxu1 %v457_v5 }
 0x1be   :  { %540 = vmatpush.msrb.mxu2 %v458_v6  ;;  %v627_v4 = vld [vmem:[#allocation3 + $0x1d0] sm:$0xff]  ;;  %v574_v5 = vld [vmem:[#allocation3 + $0x28] sm:$0xff] }
 0x1bf   :  { %v274_v10 = vadd.f32 %v837_v1, %v273_v8  ;;  %v471_v8 = vld [vmem:[%s1225_s9 + $0x78] sm:$0xff] }
 0x1c0   :  { %v587_v6 = vld [vmem:[#allocation3 + $0x90] sm:$0xff] }
 0x1c1   :  { %v278_v12 = vsel %vm277_vm13, %v837_v1, %v274_v10  ;;  %v460_v1 = vld [vmem:[%s1225_s9 + $0x20] sm:$0xff]  ;;  %v463_v10 = vld [vmem:[%s1225_s9 + $0x38] sm:$0xff] }
 0x1c2   :  { %v283_v13 = vsel %vm280_vm14, %v282_v11, %v278_v12  ;;  %499 = vmatpush.msra.mxu3 %v460_v1  ;;  %v459_v11 = vld [vmem:[%s1225_s9 + $0x18] sm:$0xff]  ;;  %v630_v1 = vld [vmem:[#allocation3 + $0x1e8] sm:$0xff] }
 0x1c3   :  { %327 = vperm.xlu2 %829, %v283_v13   ;;  %v600_v12 = vld [vmem:[#allocation3 + $0xf8] sm:$0xff]  ;;  %v599_v13 = vld [vmem:[#allocation3 + $0xf0] sm:$0xff] }
 0x1c4   :  { %500 = vmatpush.msra.mxu3 %v456_v2  ;;  %654 = vmatpush.msrb.mxu1 %v600_v12  ;;  %v629_v2 = vld [vmem:[#allocation3 + $0x1e0] sm:$0xff] }
 0x1c5   :  { %v625_v12 = vld [vmem:[#allocation3 + $0x1c0] sm:$0xff] }
 0x1c6   :  { %557 = vmatpush.msrb.mxu3 %v471_v8  ;;  %655 = vmatpush.msrb.mxu1 %v599_v13  ;;  %v626_v8 = vld [vmem:[#allocation3 + $0x1c8] sm:$0xff]  ;;  %v572_v13 = vld [vmem:[#allocation3 + $0x18] sm:$0xff] }
 0x1c8   :  { %558 = vmatpush.msrb.mxu3 %v467_v9  ;;  %v573_v9 = vld [vmem:[#allocation3 + $0x20] sm:$0xff] }
 0x1ca   :  { %559 = vmatpush.msrb.mxu3 %v463_v10  ;;  %v586_v10 = vld [vmem:[#allocation3 + $0x88] sm:$0xff] }
 0x1cc   :  { %560 = vmatpush.msrb.mxu3 %v459_v11  ;;  %v605_v11 = vld [vmem:[#allocation3 + $0x120] sm:$0xff] }
 0x215   :  { %v323_v16 = vpop.permute.xlu2 %322 }
 0x216   :  { %v330_v17 = vmul.f32 %v323_v16, %v314_v15  ;;  %v616_v15 = vld [vmem:[#allocation3 + $0x178] sm:$0xff]  ;;  %v426_v16 = vpop.f32.mrf.mxu3 }
 0x218   :  { %812 = vmatmul.msk.f32.vlgmr.msra.gmra.mxu2 %vm80_vm0, %v330_v17  ;;  %v598_v17 = vld [vmem:[#allocation3 + $0xe8] sm:$0xff] }
 0x219   :  { %674 = vmatpush.msra.mxu2 %v616_v15  ;;  %656 = vmatpush.msrb.mxu1 %v598_v17  ;;  %v604_v15 = vld [vmem:[#allocation3 + $0x118] sm:$0xff]  ;;  %v571_v17 = vld [vmem:[#allocation3 + $0x10] sm:$0xff] }
 0x21d   :  { %v328_v19 = vpop.permute.xlu2 %327 }
 0x21e   :  { %v331_v20 = vmul.f32 %v328_v19, %v317_v18  ;;  %v583_v18 = vld [vmem:[#allocation3 + $0x70] sm:$0xff] }
 0x21f   :  { %v615_v19 = vld [vmem:[#allocation3 + $0x170] sm:$0xff]  ;;  %635 = vmatpush.msrb.mxu0 %v583_v18 }
 0x220   :  { %813 = vmatmul.msk.f32.gmra.mxu2 %vm80_vm0, %v331_v20  ;;  %v603_v18 = vld [vmem:[#allocation3 + $0x110] sm:$0xff] }
 0x221   :  { %675 = vmatpush.msra.mxu2 %v615_v19  ;;  %v623_v19 = vld [vmem:[#allocation3 + $0x1b0] sm:$0xff] }
 0x29b   :  { %v359_v21 = vpop.f32.mrf.mxu2 }
 0x29c   :  { %v366_v23 = vsel %vm365_vm15, %v359_v21, -inf }
 0x2a3   :  { %v362_v22 = vpop.f32.mrf.mxu2 }
 0x2a4   :  { %v367_v24 = vsel %vm365_vm15, %v362_v22, -inf }
 0x2a5   :  { %v368_v25 = vmax.f32 %v366_v23, %v367_v24  ;;  %v614_v23 = vld [vmem:[#allocation3 + $0x168] sm:$0xff] }
 0x2a6   :  { %676 = vmatpush.msra.mxu2 %v614_v23  ;;  %v569_v23 = vld [vmem:[#allocation3] sm:$0xff] }
 0x2a7   :  { %v369_v26 = vrot.slane %v368_v25, 4 }
 0x2a9   :  { %v370_v27 = vmax.f32 %v368_v25, %v369_v26  ;;  %v597_v26 = vld [vmem:[#allocation3 + $0xe0] sm:$0xff] }
 0x2aa   :  { %657 = vmatpush.msrb.mxu1 %v597_v26  ;;  %v620_v26 = vld [vmem:[#allocation3 + $0x198] sm:$0xff] }
 0x2ab   :  { %v371_v28 = vrot.slane %v370_v27, 2 }
 0x2ad   :  { %v372_v29 = vmax.f32 %v370_v27, %v371_v28  ;;  %v596_v27 = vld [vmem:[#allocation3 + $0xd8] sm:$0xff]  ;;  %v581_v28 = vld [vmem:[#allocation3 + $0x60] sm:$0xff] }
 0x2ae   :  { %658 = vmatpush.msrb.mxu1 %v596_v27  ;;  %v619_v27 = vld [vmem:[#allocation3 + $0x190] sm:$0xff] }
 0x2af   :  { %v373_v30 = vrot.slane %v372_v29, 1 }
 0x2b1   :  { %v374_v31 = vmax.f32 %v372_v29, %v373_v30  ;;  %v613_v29 = vld [vmem:[#allocation3 + $0x160] sm:$0xff] }
 0x2b2   :  { %677 = vmatpush.msra.mxu2 %v613_v29  ;;  %v617_v29 = vld [vmem:[#allocation3 + $0x180] sm:$0xff] }
 0x2b3   :  { %v375_v32 = vsub.f32 %v359_v21, %v374_v31  ;;  %v376_v33 = vsub.f32 %v362_v22, %v374_v31  ;;  %v582_v22 = vld [vmem:[#allocation3 + $0x68] sm:$0xff] }
 0x2b4   :  { %636 = vmatpush.msrb.mxu0 %v582_v22  ;;  %v622_v22 = vld [vmem:[#allocation3 + $0x1a8] sm:$0xff] }
 0x2b5   :  { %v377_v34 = vmul.f32 1.442695, %v375_v32  ;;  %v379_v35 = vmul.f32 1.442695, %v376_v33  ;;  %v580_v32 = vld [vmem:[#allocation3 + $0x58] sm:$0xff] }
 0x2b6   :  { %v612_v33 = vld [vmem:[#allocation3 + $0x158] sm:$0xff]  ;;  %637 = vmatpush.msrb.mxu0 %v581_v28  ;;  %v618_v28 = vld [vmem:[#allocation3 + $0x188] sm:$0xff] }
 0x2b7   :  { %838 = vpow2.f32 %v377_v34  ;;  %678 = vmatpush.msra.mxu2 %v612_v33  ;;  %v472_v33 = vld [vmem:[%s1226_s10] sm:$0xf] }
 0x2b8   :  { %840 = vpow2.f32 %v379_v35  ;;  %638 = vmatpush.msrb.mxu0 %v580_v32  ;;  %v728_v32 = vld [vmem:[%s1229_s13 + $0x68] sm:$0xff] }
 0x2bd   :  { %v839_v36 = vpop.eup %838 }
 0x2be   :  { %v841_v37 = vpop.eup %840  ;;  %v381_v38 = vsel %vm365_vm15, %v839_v36, 0.0 }
 0x2bf   :  { %v382_v39 = vsel %vm365_vm15, %v841_v37, 0.0 }
 0x2c0   :  { %v383_v40 = vadd.f32 %v382_v39, %v381_v38  ;;  %v579_v39 = vld [vmem:[#allocation3 + $0x50] sm:$0xff] }
 0x2c1   :  { %639 = vmatpush.msrb.mxu0 %v579_v39  ;;  %v476_v39 = vperm.slane %v472_v33, 2 }
 0x2c2   :  { %v384_v41 = vrot.slane %v383_v40, 4 }
 0x2c4   :  { %v385_v42 = vadd.f32 %v384_v41, %v383_v40  ;;  %v611_v40 = vld [vmem:[#allocation3 + $0x150] sm:$0xff] }
 0x2c5   :  { %679 = vmatpush.msra.mxu2 %v611_v40 }
 0x2c6   :  { %v386_v43 = vrot.slane %v385_v42, 2 }
 0x2c8   :  { %v387_v44 = vadd.f32 %v386_v43, %v385_v42  ;;  %v594_v42 = vld [vmem:[#allocation3 + $0xc8] sm:$0xff] }
 0x2c9   :  { %v578_v43 = vld [vmem:[#allocation3 + $0x48] sm:$0xff] }
 0x2ca   :  { %v388_v45 = vrot.slane %v387_v44, 1  ;;  %640 = vmatpush.msrb.mxu0 %v578_v43 }
 0x2cc   :  { %v389_v46 = vadd.f32 %v388_v45, %v387_v44  ;;  %v610_v44 = vld [vmem:[#allocation3 + $0x148] sm:$0xff] }
 0x2cd   :  { %680 = vmatpush.msra.mxu2 %v610_v44 }
 0x2ce   :  { %842 = vrcp.f32 %v389_v46  ;;  %v401_v50 = vand.u32 2147483648, %v389_v46  ;;  %v399_v52 = vand.u32 2147483647, %v389_v46  ;;  %vm395_vm2 = vweird.f32 %v389_v46 }
 0x2d0   :  { %v402_v54 = vor.u32 1.1754944e-38, %v401_v50  ;;  %vm400_vm4 = vcmp.eq.f32.partialorder %v399_v52, 8.507059e+37  ;;  %v592_v50 = vld [vmem:[#allocation3 + $0xb8] sm:$0xff] }
 0x2d1   :  { %v608_v52 = vld [vmem:[#allocation3 + $0x138] sm:$0xff] }
 0x2d4   :  { %v843_v47 = vpop.eup %842 }
 0x2d5   :  { %v391_v48 = vmul.f32 %v843_v47, %v389_v46  ;;  %vm396_vm1 = vweird.f32 %v843_v47  ;;  %v593_v46 = vld [vmem:[#allocation3 + $0xc0] sm:$0xff] }
 0x2d6   :  { %vm397_vm3 = vmor %vm395_vm2, %vm396_vm1 }
 0x2d7   :  { %v392_v49 = vsub.f32 1.0, %v391_v48  ;;  %v609_v48 = vld [vmem:[#allocation3 + $0x140] sm:$0xff] }
 0x2d8   :  { %681 = vmatpush.msra.mxu2 %v609_v48 }
 0x2d9   :  { %v393_v51 = vmul.f32 %v843_v47, %v392_v49 }
 0x2da   :  { %682 = vmatpush.msra.mxu2 %v608_v52  ;;  %v725_v52 = vld [vmem:[%s1229_s13 + $0x50] sm:$0xff] }
 0x2db   :  { %v394_v53 = vadd.f32 %v843_v47, %v393_v51  ;;  %v576_v51 = vld [vmem:[#allocation3 + $0x38] sm:$0xff] }
 0x2dd   :  { %v398_v55 = vsel %vm397_vm3, %v843_v47, %v394_v53  ;;  %v577_v47 = vld [vmem:[#allocation3 + $0x40] sm:$0xff] }
 0x2de   :  { %v403_v56 = vsel %vm400_vm4, %v402_v54, %v398_v55  ;;  %v591_v54 = vld [vmem:[#allocation3 + $0xb0] sm:$0xff]  ;;  %641 = vmatpush.msrb.mxu0 %v577_v47 }
 0x2df   :  { %v405_v57 = vmul.f32 %v841_v37, %v403_v56  ;;  %v404_v58 = vmul.f32 %v839_v36, %v403_v56  ;;  %v595_v36 = vld [vmem:[#allocation3 + $0xd0] sm:$0xff] }
 0x2e0   :  { %659 = vmatpush.msrb.mxu1 %v595_v36  ;;  %v575_v55 = vld [vmem:[#allocation3 + $0x30] sm:$0xff]  ;;  %642 = vmatpush.msrb.mxu0 %v576_v51 }
 0x2e1   :  { %436 = vperm.xlu1 %828, %v405_v57   ;;  %431 = vperm.xlu0 %827, %v404_v58   ;;  %v607_v56 = vld [vmem:[#allocation3 + $0x130] sm:$0xff]  ;;  %v590_v58 = vld [vmem:[#allocation3 + $0xa8] sm:$0xff] }
 0x2e2   :  { %660 = vmatpush.msrb.mxu1 %v594_v42  ;;  %643 = vmatpush.msrb.mxu0 %v575_v55  ;;  %v726_v51 = vld [vmem:[%s1229_s13 + $0x58] sm:$0xff] }
 0x2e3   :  { %683 = vmatpush.msra.mxu2 %v607_v56  ;;  %v722_v55 = vld [vmem:[%s1229_s13 + $0x38] sm:$0xff]  ;;  %v721_v56 = vld [vmem:[%s1229_s13 + $0x30] sm:$0xff] }
 0x2e4   :  { %661 = vmatpush.msrb.mxu1 %v593_v46  ;;  %644 = vmatpush.msrb.mxu0 %v574_v5  ;;  %v477_v46 = vperm.slane %v472_v33, 3 }
 0x2e6   :  { %662 = vmatpush.msrb.mxu1 %v592_v50  ;;  %645 = vmatpush.msrb.mxu0 %v573_v9  ;;  %v727_v50 = vld [vmem:[%s1229_s13 + $0x60] sm:$0xff] }
 0x2e8   :  { %663 = vmatpush.msrb.mxu1 %v591_v54  ;;  %646 = vmatpush.msrb.mxu0 %v572_v13  ;;  %v723_v54 = vld [vmem:[%s1229_s13 + $0x40] sm:$0xff] }
 0x2ea   :  { %664 = vmatpush.msrb.mxu1 %v590_v58  ;;  %647 = vmatpush.msrb.mxu0 %v571_v17  ;;  %v719_v58 = vld [vmem:[%s1229_s13 + $0x20] sm:$0xff] }
 0x2ec   :  { %665 = vmatpush.msrb.mxu1 %v589_v60  ;;  %v717_v60 = vld [vmem:[%s1229_s13 + $0x10] sm:$0xff] }
 0x2ee   :  { %666 = vmatpush.msrb.mxu1 %v588_v63  ;;  %v754_v63 = vld [vmem:[%s1231_s15 + $0x8] sm:$0xff] }
 0x2f0   :  { %667 = vmatpush.msrb.mxu1 %v587_v6 }
 0x2f2   :  { %668 = vmatpush.msrb.mxu1 %v586_v10  ;;  %v753_v10 = vld [vmem:[%s1231_s15] sm:$0xff] }
 0x2f4   :  { %669 = vmatpush.msrb.mxu1 %v585_v14 }
 0x353   :  { %v437_v20 = vpop.permute.xlu1 %436  ;;  %v432_v21 = vpop.permute.xlu0 %431 }
 0x354   :  { %v440_v24 = vmul.f32 %v437_v20, %v426_v16  ;;  %v439_v25 = vmul.f32 %v432_v21, %v423_v7  ;;  %v606_v7 = vld [vmem:[#allocation3 + $0x128] sm:$0xff]  ;;  %v624_v16 = vld [vmem:[#allocation3 + $0x1b8] sm:$0xff] }
 0x355   :  { %684 = vmatpush.msra.mxu2 %v606_v7  ;;  %v570_v20 = vld [vmem:[#allocation3 + $0x8] sm:$0xff] }
 0x356   :  { %vm442_vm5 = vcmp.gt.f32.partialorder %v440_v24, 0.0  ;;  %v444_v30 = vmul.f32 0.01, %v440_v24  ;;  %vm441_vm6 = vcmp.gt.f32.partialorder %v439_v25, 0.0  ;;  %v443_v31 = vmul.f32 0.01, %v439_v25  ;;  %648 = vmatpush.msrb.mxu0 %v570_v20 }
 0x357   :  { %685 = vmatpush.msra.mxu2 %v605_v11  ;;  %v602_v21 = vld [vmem:[#allocation3 + $0x108] sm:$0xff]  ;;  %v731_v11 = vld [vmem:[%s1230_s14] sm:$0x1] }
 0x358   :  { %v446_v34 = vsel %vm442_vm5, %v440_v24, %v444_v30  ;;  %v445_v35 = vsel %vm441_vm6, %v439_v25, %v443_v31  ;;  %v601_v24 = vld [vmem:[#allocation3 + $0x100] sm:$0xff]  ;;  %649 = vmatpush.msrb.mxu0 %v569_v23  ;;  %v730_v30 = vld [vmem:[%s1229_s13 + $0x78] sm:$0xff]  ;;  %v729_v31 = vld [vmem:[%s1229_s13 + $0x70] sm:$0xff] }
 0x359   :  { %v448_v37 = vsel %vm80_vm0, %v446_v34, 0.0  ;;  %v447_v38 = vsel %vm80_vm0, %v445_v35, 0.0  ;;  %686 = vmatpush.msra.mxu2 %v604_v15  ;;  %v621_v25 = vld [vmem:[#allocation3 + $0x1a0] sm:$0xff]  ;;  %v475_v34 = vperm.slane %v472_v33, 1  ;;  %v755_v15 = vld [vmem:[#allocation2] sm:$0x1] }
 0x35a   :  { %v449_v41 = vadd.f32 %v448_v37, %v447_v38  ;;  %732 = vmatpush.msra.mxu0 %v730_v30  ;;  %v474_v38 = vperm.slane %v472_v33, 0 }
 0x35b   :  { %687 = vmatpush.msra.mxu2 %v603_v18 }
 0x35c   :  { %v450_v45 = vrot.slane %v449_v41, 4  ;;  %733 = vmatpush.msra.mxu0 %v729_v31 }
 0x35d   :  { %688 = vmatpush.msra.mxu2 %v602_v21 }
 0x35e   :  { %v451_v49 = vadd.f32 %v450_v45, %v449_v41  ;;  %734 = vmatpush.msra.mxu0 %v728_v32 }
 0x35f   :  { %689 = vmatpush.msra.mxu2 %v601_v24 }
 0x360   :  { %v452_v53 = vrot.slane %v451_v49, 2  ;;  %735 = vmatpush.msra.mxu0 %v727_v50 }
 0x362   :  { %v453_v57 = vadd.f32 %v452_v53, %v451_v49  ;;  %736 = vmatpush.msra.mxu0 %v726_v51  ;;  %v724_v53 = vld [vmem:[%s1229_s13 + $0x48] sm:$0xff] }
 0x364   :  { %v454_v59 = vrot.slane %v453_v57, 1  ;;  %737 = vmatpush.msra.mxu0 %v725_v52 }
 0x366   :  { %v455_v61 = vadd.f32 %v454_v59, %v453_v57  ;;  %738 = vmatpush.msra.mxu0 %v724_v53  ;;  %v720_v57 = vld [vmem:[%s1229_s13 + $0x28] sm:$0xff]  ;;  %v718_v59 = vld [vmem:[%s1229_s13 + $0x18] sm:$0xff] }
 0x368   :  { %816 = vmatmul.msk.f32.vlgmr.msra.gmra.mxu3 %vm80_vm0, %v455_v61  ;;  %817 = vmatmul.msk.f32.vlgmr.msra.gmra.mxu1 %vm80_vm0, %v455_v61 }
 0x369   :  { %818 = vmatmul.msk.f32.vlgmr.msrb.gmra.mxu2 %vm80_vm0, %v455_v61  ;;  %694 = vmatpush.msra.mxu3 %v632_v62  ;;  %v715_v62 = vld [vmem:[%s1229_s13] sm:$0xff] }
 0x36a   :  { %739 = vmatpush.msra.mxu0 %v723_v54  ;;  %774 = vmatpush.msra.mxu1 %v754_v63 }
 0x36b   :  { %695 = vmatpush.msra.mxu3 %v631_v0  ;;  %v633_v0 = vld [vmem:[%s1228_s12] sm:$0x1]  ;;  %s901_s12 = smov [#allocation6]  }
 0x36c   :  { %740 = vmatpush.msra.mxu0 %v722_v55  ;;  %775 = vmatpush.msra.mxu1 %v753_v10  ;;  %s787_s27 = sshll.u32 %s901_s12, 4  ;;  %s788_s27 = int_to_ptr.vmem [resolvable:$true] %s787_s27 }
 0x36d   :  { %696 = vmatpush.msra.mxu3 %v630_v1 }
 0x36e   :  { %741 = vmatpush.msra.mxu0 %v721_v56 }
 0x36f   :  { %697 = vmatpush.msra.mxu3 %v629_v2 }
 0x370   :  { %819 = vmatmul.msk.f32.vlgmr.msrb.gmra.mxu3 %vm80_vm0, %v455_v61  ;;  %742 = vmatpush.msra.mxu0 %v720_v57  ;;  %v716_v61 = vld [vmem:[%s1229_s13 + $0x8] sm:$0xff]  ;;  %vm756_vm0 = vcmask 130048  }
 0x371   :  { %698 = vmatpush.msra.mxu3 %v628_v3 }
 0x372   :  { %743 = vmatpush.msra.mxu0 %v719_v58 }
 0x373   :  { %699 = vmatpush.msra.mxu3 %v627_v4 }
 0x374   :  { %744 = vmatpush.msra.mxu0 %v718_v59 }
 0x375   :  { %700 = vmatpush.msra.mxu3 %v626_v8 }
 0x376   :  { %745 = vmatpush.msra.mxu0 %v717_v60 }
 0x377   :  { %701 = vmatpush.msra.mxu3 %v625_v12 }
 0x378   :  { %746 = vmatpush.msra.mxu0 %v716_v61 }
 0x379   :  { %702 = vmatpush.msra.mxu3 %v624_v16 }
 0x37a   :  { %747 = vmatpush.msra.mxu0 %v715_v62 }
 0x37b   :  { %703 = vmatpush.msra.mxu3 %v623_v19 }
 0x37d   :  { %704 = vmatpush.msra.mxu3 %v622_v22 }
 0x37f   :  { %705 = vmatpush.msra.mxu3 %v621_v25 }
 0x381   :  { %706 = vmatpush.msra.mxu3 %v620_v26 }
 0x383   :  { %707 = vmatpush.msra.mxu3 %v619_v27 }
 0x385   :  { %708 = vmatpush.msra.mxu3 %v618_v28 }
 0x387   :  { %709 = vmatpush.msra.mxu3 %v617_v29 }
 0x3e5   :  { %v522_v35 = vpop.f32.mrf.mxu1 }
 0x3e6   :  { %v523_v36 = vadd.f32 %v522_v35, %v475_v34 }
 0x3e8   :  { %v566_v37 = vmax.f32 %v523_v36, 0.0 }
 0x3ea   :  { %670 = vmatmul.f32.vlgmr.msrb.gmra.mxu1 %v566_v37 }
 0x3eb   :  { %v502_v40 = vpop.f32.mrf.mxu3 }
 0x3ec   :  { %v503_v41 = vadd.f32 %v502_v40, %v474_v38  ;;  %v542_v42 = vpop.f32.mrf.mxu2 }
 0x3ed   :  { %v543_v43 = vadd.f32 %v542_v42, %v476_v39 }
 0x3ee   :  { %v565_v44 = vmax.f32 %v503_v41, 0.0 }
 0x3ef   :  { %v567_v45 = vmax.f32 %v543_v43, 0.0 }
 0x3f0   :  { %650 = vmatmul.f32.vlgmr.msrb.gmra.mxu0 %v565_v44 }
 0x3f1   :  { %690 = vmatmul.f32.vlgmr.msra.gmra.mxu2 %v567_v45 }
 0x3f3   :  { %v562_v47 = vpop.f32.mrf.mxu3 }
 0x3f4   :  { %v563_v48 = vadd.f32 %v562_v47, %v477_v46 }
 0x3f6   :  { %v568_v49 = vmax.f32 %v563_v48, 0.0 }
 0x3f8   :  { %710 = vmatmul.f32.vlgmr.msra.gmra.mxu3 %v568_v49 }
 0x467   :  { %v671_v3 = vpop.f32.mrf.mxu1 }
 0x46d   :  { %v651_v1 = vpop.f32.mrf.mxu0 }
 0x46e   :  { %v652_v2 = vadd.f32 %v651_v1, %v633_v0 }
 0x470   :  { %v672_v5 = vadd.f32 %v671_v3, %v652_v2 }
 0x474   :  { %v691_v4 = vpop.f32.mrf.mxu2 }
 0x475   :  { %v692_v6 = vadd.f32 %v691_v4, %v672_v5 }
 0x47b   :  { %v711_v7 = vpop.f32.mrf.mxu3 }
 0x47c   :  { %v712_v8 = vadd.f32 %v711_v7, %v692_v6 }
 0x47e   :  { %v714_v9 = vmax.f32 %v712_v8, 0.0 }
 0x480   :  { %748 = vmatmul.f32.vlgmr.msra.gmra.mxu0 %v714_v9 }
 0x4fd   :  { %v749_v12 = vpop.f32.mrf.mxu0 }
 0x4fe   :  { %v750_v13 = vadd.f32 %v749_v12, %v731_v11 }
 0x500   :  { %v752_v14 = vmax.f32 %v750_v13, 0.0 }
 0x502   :  { %820 = vmatmul.msk.f32.vlgmr.msra.gmra.mxu1 %vm756_vm0, %v752_v14 }
 0x57f   :  { %v777_v16 = vpop.f32.mrf.mxu1 }
 0x580   :  { %v778_v17 = vadd.f32 %v777_v16, %v755_v15 }
 0x582   :  { %781 = vst.msk [vmem:[#allocation6] sm:$0x1] %vm780_vm7, %v778_v17 }
 0x583   :  { %792 = dma.vmem_to_hbm [thread:$0]  %s788_s27, 16, %s790_s8, [#allocation5]  }
 0x584   :  { %894 = dma.done.wait [#allocation5], 16  }
 0x585   :  { %895 = vsyncadd [#allocation5], 4294967280 }
 0x586   :  { %797 = vsyncpa [#allocation4], 1 }
 0x587   :  { %798 = vsyncpa [#allocation5], 1 }

</bundles_post_ra>
